<compile_context>
chip_gen: v6e
topology: v6e:2x2x1
jax: 0.10.0
libtpu: 0.0.40
codegen_flags: <defaults>
</compile_context>

<pallas_src>
import jax
import jax.numpy as jnp
import numpy as np
from jax.experimental import pallas as pl
from jax.experimental.pallas import tpu as pltpu


# ---------------------------------------------------------------------------
# Constants built once per model (masks folded in, construction hoisted).
# ---------------------------------------------------------------------------
def make_fused_params(params, adj_xx, adj_xu):
    """Block-diagonal fusion of a_net/b_net + masks, for the single-step kernel.

    Returns (w1, b1, w2, b2, r, g) such that
      h   = tanh([zx|zu] @ w1 + b1)
      m   = h @ w2 + b2
      rep = [x|u] @ r                # masked, replicated x|u
      out = (m * rep) @ g            # == A(x, zx) + B(u, zu)
    Valid because the off-diagonal blocks of w1/w2 are exactly zero.
    """
    w1a, b1a, w2a, b2a, w1b, b1b, w2b, b2b = params
    f32 = jnp.float32
    S, H = w1a.shape
    A = w1b.shape[0]
    Ma, Mb = S * S, S * A

    w1 = jnp.concatenate(
        [jnp.concatenate([w1a, jnp.zeros((S, H), f32)], axis=1),
         jnp.concatenate([jnp.zeros((A, H), f32), w1b], axis=1)], axis=0)
    b1 = jnp.concatenate([b1a, b1b], axis=1)
    w2 = jnp.concatenate(
        [jnp.concatenate([w2a, jnp.zeros((H, Mb), f32)], axis=1),
         jnp.concatenate([jnp.zeros((H, Ma), f32), w2b], axis=1)], axis=0)
    b2 = jnp.concatenate([b2a, b2b], axis=1)

    # Replicate matrices with the adjacency masks pre-folded in.
    ra = jnp.tile(jnp.eye(S, dtype=f32), (1, S)) * adj_xx.astype(f32).reshape(1, Ma)
    rb = jnp.tile(jnp.eye(A, dtype=f32), (1, S)) * adj_xu.astype(f32).reshape(1, Mb)
    r = jnp.concatenate(
        [jnp.concatenate([ra, jnp.zeros((S, Mb), f32)], axis=1),
         jnp.concatenate([jnp.zeros((A, Ma), f32), rb], axis=1)], axis=0)

    # Group-sum matrices (sum over j within each output row i).
    ga = jnp.repeat(jnp.eye(S, dtype=f32), S, axis=0)   # [S*S, S]
    gb = jnp.repeat(jnp.eye(S, dtype=f32), A, axis=0)   # [S*A, S]
    g = jnp.concatenate([ga, gb], axis=0)

    return (w1, b1, w2, b2, r, g)


def make_branch_params(params, adj_xx, adj_xu):
    """Per-branch constants for the rollout kernel (u-branch hoisted, so the
    branches are kept separate rather than block-diag fused)."""
    w1a, b1a, w2a, b2a, w1b, b1b, w2b, b2b = params
    f32 = jnp.float32
    S, H = w1a.shape
    A = w1b.shape[0]
    ra = jnp.tile(jnp.eye(S, dtype=f32), (1, S)) * adj_xx.astype(f32).reshape(1, S * S)
    rb = jnp.tile(jnp.eye(A, dtype=f32), (1, S)) * adj_xu.astype(f32).reshape(1, S * A)
    ga = jnp.repeat(jnp.eye(S, dtype=f32), S, axis=0)   # [S*S, S]
    gb = jnp.repeat(jnp.eye(S, dtype=f32), A, axis=0)   # [S*A, S]
    return (w1a, b1a, w2a, b2a, ra, ga, w1b, b1b, w2b, b2b, rb, gb)


# ---------------------------------------------------------------------------
# Single-step forward kernel (fused A+B branches, no grid).
# ---------------------------------------------------------------------------
def _hyper_ssm_step_kernel(z_ref, xu_ref, w1_ref, b1_ref, w2_ref, b2_ref,
                           r_ref, g_ref, out_ref):
    f32 = jnp.float32
    h = jnp.tanh(jnp.dot(z_ref[...], w1_ref[...], preferred_element_type=f32)
                 + b1_ref[...])
    m = jnp.dot(h, w2_ref[...], preferred_element_type=f32) + b2_ref[...]
    rep = jnp.dot(xu_ref[...], r_ref[...], preferred_element_type=f32)
    out_ref[...] = jnp.dot(m * rep, g_ref[...], preferred_element_type=f32)


def hyper_linear_ssm_forward(x, u, fused, zx=None, zu=None):
    """One HyperLinearSSM step: A(x, zx) + B(u, zu).  x,zx: [B,S]  u,zu: [B,A]."""
    if zx is None:
        zx = x
    if zu is None:
        zu = u
    w1, b1, w2, b2, r, g = fused
    B, S = x.shape
    A = u.shape[1]
    D, H2 = w1.shape          # S+A, 2H
    M = w2.shape[1]           # S*S + S*A

    # Tiny wrapper-side concats (fused by XLA under jit); keeps unaligned
    # lane-dim concatenation out of the kernel.
    z = jnp.concatenate([zx, zu], axis=1)    # [B, S+A]
    xu = jnp.concatenate([x, u], axis=1)     # [B, S+A]

    inputs = (z, xu, w1, b1, w2, b2, r, g)
    flops = 2 * B * (D * H2 + H2 * M + D * M + M * S) + 2 * B * M
    n_elems = 2 * B * D + D * H2 + H2 + H2 * M + M + D * M + M * S + B * S

    vmem = pl.BlockSpec(memory_space=pltpu.MemorySpace.VMEM)
    return pl.pallas_call(
        _hyper_ssm_step_kernel,
        out_shape=jax.ShapeDtypeStruct((B, S), jnp.float32),
        in_specs=[vmem] * len(inputs),
        out_specs=vmem,
        cost_estimate=pl.CostEstimate(
            flops=flops, transcendentals=B * H2, bytes_accessed=4 * n_elems),
    )(*inputs)


# ---------------------------------------------------------------------------
# Rollout kernel: single launch, no grid, u-branch hoisted, lane-dense output.
# ---------------------------------------------------------------------------
def _hyper_ssm_rollout_kernel(x0_ref, us_ref,
                              w1a_ref, b1a_ref, w2a_ref, b2a_ref, ra_ref, ga_ref,
                              w1b_ref, b1b_ref, w2b_ref, b2b_ref, rb_ref, gb_ref,
                              out_ref, outb_sc):
    f32 = jnp.float32
    B, S = x0_ref.shape
    TB, A = us_ref.shape
    T = TB // B

    # --- u-only branch, hoisted: all T steps as one T*B-row batched pass ---
    # (valid because rollout calls forward with zu == u_t)
    u_all = us_ref[...]                                                 # [T*B, A]
    hb = jnp.tanh(jnp.dot(u_all, w1b_ref[...], preferred_element_type=f32)
                  + b1b_ref[...])
    mb = jnp.dot(hb, w2b_ref[...], preferred_element_type=f32) + b2b_ref[...]
    rep_u = jnp.dot(u_all, rb_ref[...], preferred_element_type=f32)
    outb_sc[...] = jnp.dot(mb * rep_u, gb_ref[...],
                           preferred_element_type=f32)                  # [T*B, S]

    # --- serial x-branch recurrence, fully unrolled with static offsets ---
    x = x0_ref[...]                                                     # [B, S]
    for t in range(T):
        ha = jnp.tanh(jnp.dot(x, w1a_ref[...], preferred_element_type=f32)
                      + b1a_ref[...])
        ma = jnp.dot(ha, w2a_ref[...], preferred_element_type=f32) + b2a_ref[...]
        rep_x = jnp.dot(x, ra_ref[...], preferred_element_type=f32)
        x = (jnp.dot(ma * rep_x, ga_ref[...], preferred_element_type=f32)
             + outb_sc[t * B:(t + 1) * B, :])
        # Lane-dense resident output slab (B, T*S); one HBM store at the end.
        out_ref[:, t * S:(t + 1) * S] = x


def hyper_linear_ssm_rollout(x0, us, branch):
    """Rollout x_{t+1} = forward(x_t, u_t).  x0: [B,S], us: [B,T,A] -> [B,T,S].

    Single pallas_call with NO grid: weights, constants and the whole `us`
    tensor are VMEM-resident for all T steps; the states are packed into a
    lane-dense (B, T*S) output block and reshaped to [B,T,S] in the wrapper.
    """
    (w1a, b1a, w2a, b2a, ra, ga, w1b, b1b, w2b, b2b, rb, gb) = branch
    B, S = x0.shape
    T, A = us.shape[1], us.shape[2]
    H = w1a.shape[1]

    # [T*B, A] with row index t*B + b, matching the per-step batch layout.
    us_flat = jnp.transpose(us, (1, 0, 2)).reshape(T * B, A)

    inputs = (x0, us_flat, w1a, b1a, w2a, b2a, ra, ga, w1b, b1b, w2b, b2b, rb, gb)

    flops = (2 * T * B * (A * H + H * S * A + A * S * A + S * A * S) + T * B * S * A
             + T * (2 * B * (S * H + H * S * S + 2 * S * S * S) + B * S * S))
    n_elems = (B * S + T * B * A
               + S * H + H + H * S * S + S * S + S * S * S + S * S * S
               + A * H + H + H * S * A + S * A + A * S * A + S * A * S
               + B * T * S)

    vmem = pl.BlockSpec(memory_space=pltpu.MemorySpace.VMEM)
    out_flat = pl.pallas_call(
        _hyper_ssm_rollout_kernel,
        out_shape=jax.ShapeDtypeStruct((B, T * S), jnp.float32),
        in_specs=[vmem] * len(inputs),
        out_specs=vmem,
        scratch_shapes=[pltpu.VMEM((T * B, S), jnp.float32)],
        cost_estimate=pl.CostEstimate(
            flops=flops, transcendentals=2 * T * B * H,
            bytes_accessed=4 * n_elems),
    )(*inputs)

    # (B, T*S) -> (B, T, S): row-major, so [b, t*S + s] == x_{t+1}[b, s].
    return out_flat.reshape(B, T, S)


# ---------------------------------------------------------------------------
# Pure-JAX references matching the PyTorch module semantics (full precision).
# ---------------------------------------------------------------------------
def reference_forward(x, u, params, adj_xx, adj_xu, zx=None, zu=None):
    if zx is None:
        zx = x
    if zu is None:
        zu = u
    hp = jax.lax.Precision.HIGHEST
    w1a, b1a, w2a, b2a, w1b, b1b, w2b, b2b = params
    B, S = x.shape
    A = u.shape[1]
    ha = jnp.tanh(jnp.dot(zx, w1a, precision=hp) + b1a)
    Ma = (jnp.dot(ha, w2a, precision=hp) + b2a).reshape(B, S, S) * adj_xx[None]
    hb = jnp.tanh(jnp.dot(zu, w1b, precision=hp) + b1b)
    Mb = (jnp.dot(hb, w2b, precision=hp) + b2b).reshape(B, S, A) * adj_xu[None]
    return (jnp.einsum("bij,bj->bi", Ma, x, precision=hp)
            + jnp.einsum("bij,bj->bi", Mb, u, precision=hp))


def reference_rollout(x0, us, params, adj_xx, adj_xu):
    def step(x, u):
        x_next = reference_forward(x, u, params, adj_xx, adj_xu)
        return x_next, x_next
    _, xs = jax.lax.scan(step, x0, jnp.transpose(us, (1, 0, 2)))
    return jnp.transpose(xs, (1, 0, 2))      # [B, T, S]


if __name__ == "__main__":
    B, S, A, H, T = 8, 8, 4, 32, 16   # batch, state, action, hypernet hidden, time

    key = jax.random.PRNGKey(0)
    ks = jax.random.split(key, 13)

    # Deterministic synthetic a_net / b_net weights (2-layer MLPs).
    w1a = 0.1 * jax.random.normal(ks[0], (S, H), jnp.float32)
    b1a = 0.1 * jax.random.normal(ks[1], (1, H), jnp.float32)
    w2a = 0.1 * jax.random.normal(ks[2], (H, S * S), jnp.float32)
    b2a = 0.1 * jax.random.normal(ks[3], (1, S * S), jnp.float32)
    w1b = 0.1 * jax.random.normal(ks[4], (A, H), jnp.float32)
    b1b = 0.1 * jax.random.normal(ks[5], (1, H), jnp.float32)
    w2b = 0.1 * jax.random.normal(ks[6], (H, S * A), jnp.float32)
    b2b = 0.1 * jax.random.normal(ks[7], (1, S * A), jnp.float32)
    params = (w1a, b1a, w2a, b2a, w1b, b1b, w2b, b2b)

    # Adjacency masks: lower-triangular state coupling, dense state<-action.
    adj_xx = jnp.tril(jnp.ones((S, S), jnp.float32))
    adj_xu = jnp.ones((S, A), jnp.float32)

    # Built ONCE per model (masks folded into constants, construction hoisted).
    fused = make_fused_params(params, adj_xx, adj_xu)
    branch = make_branch_params(params, adj_xx, adj_xu)

    fwd_fn = jax.jit(hyper_linear_ssm_forward)
    rollout_fn = jax.jit(hyper_linear_ssm_rollout)

    x = jax.random.normal(ks[8], (B, S), jnp.float32)
    u = jax.random.normal(ks[9], (B, A), jnp.float32)
    zx = jax.random.normal(ks[10], (B, S), jnp.float32)
    zu = jax.random.normal(ks[11], (B, A), jnp.float32)
    us = jax.random.normal(ks[12], (B, T, A), jnp.float32)

    # -- single-step forward (default zx=x, zu=u) ----------------------------
    out = jax.block_until_ready(fwd_fn(x, u, fused))
    ref = reference_forward(x, u, params, adj_xx, adj_xu)
    assert out.shape == (B, S)
    assert np.allclose(np.asarray(out), np.asarray(ref), atol=1e-3, rtol=1e-3)

    # -- single-step forward with explicit hypernetwork inputs ----------------
    out2 = jax.block_until_ready(fwd_fn(x, u, fused, zx, zu))
    ref2 = reference_forward(x, u, params, adj_xx, adj_xu, zx, zu)
    assert np.allclose(np.asarray(out2), np.asarray(ref2), atol=1e-3, rtol=1e-3)

    # -- full rollout: one launch, no grid, lane-dense output -----------------
    xs = jax.block_until_ready(rollout_fn(x, us, branch))
    xs_ref = reference_rollout(x, us, params, adj_xx, adj_xu)
    assert xs.shape == (B, T, S)
    assert np.allclose(np.asarray(xs), np.asarray(xs_ref), atol=5e-3, rtol=5e-3)

    print("KERNEL_OK")
</pallas_src>

<mosaic_0001>
module attributes {stable_mosaic.version = 11 : i64} {
  func.func @_hyper_ssm_step_kernel(%arg0: memref<8x12xf32, #tpu.memory_space<vmem>>, %arg1: memref<8x12xf32, #tpu.memory_space<vmem>>, %arg2: memref<12x64xf32, #tpu.memory_space<vmem>>, %arg3: memref<1x64xf32, #tpu.memory_space<vmem>>, %arg4: memref<64x96xf32, #tpu.memory_space<vmem>>, %arg5: memref<1x96xf32, #tpu.memory_space<vmem>>, %arg6: memref<12x96xf32, #tpu.memory_space<vmem>>, %arg7: memref<96x8xf32, #tpu.memory_space<vmem>>, %arg8: memref<8x8xf32, #tpu.memory_space<vmem>>) attributes {dimension_semantics = [], scalar_prefetch = 0 : i64, scratch_operands = 0 : i64, tpu.core_type = #tpu.core_type<tc>} {
    %c0 = arith.constant 0 : index
    %c0_0 = arith.constant 0 : index
    %0 = vector.load %arg0[%c0, %c0_0] : memref<8x12xf32, #tpu.memory_space<vmem>>, vector<8x12xf32>
    %c0_1 = arith.constant 0 : index
    %c0_2 = arith.constant 0 : index
    %1 = vector.load %arg2[%c0_1, %c0_2] : memref<12x64xf32, #tpu.memory_space<vmem>>, vector<12x64xf32>
    %cst = arith.constant dense<0.000000e+00> : vector<8x64xf32>
    %2 = tpu.matmul %0, %1, %cst {dimension_numbers = #tpu.dot_dimension_numbers<[1], [0], [0], [1], [0, 0, 1, 1], [], []>} : vector<8x12xf32>, vector<12x64xf32>, vector<8x64xf32> -> vector<8x64xf32>
    %c0_3 = arith.constant 0 : index
    %c0_4 = arith.constant 0 : index
    %3 = vector.load %arg3[%c0_3, %c0_4] : memref<1x64xf32, #tpu.memory_space<vmem>>, vector<1x64xf32>
    %4 = vector.broadcast %3 : vector<1x64xf32> to vector<8x64xf32>
    %5 = arith.addf %2, %4 : vector<8x64xf32>
    %6 = math.tanh %5 : vector<8x64xf32>
    %c0_5 = arith.constant 0 : index
    %c0_6 = arith.constant 0 : index
    %7 = vector.load %arg4[%c0_5, %c0_6] : memref<64x96xf32, #tpu.memory_space<vmem>>, vector<64x96xf32>
    %cst_7 = arith.constant dense<0.000000e+00> : vector<8x96xf32>
    %8 = tpu.matmul %6, %7, %cst_7 {dimension_numbers = #tpu.dot_dimension_numbers<[1], [0], [0], [1], [0, 0, 1, 1], [], []>} : vector<8x64xf32>, vector<64x96xf32>, vector<8x96xf32> -> vector<8x96xf32>
    %c0_8 = arith.constant 0 : index
    %c0_9 = arith.constant 0 : index
    %9 = vector.load %arg5[%c0_8, %c0_9] : memref<1x96xf32, #tpu.memory_space<vmem>>, vector<1x96xf32>
    %10 = vector.broadcast %9 : vector<1x96xf32> to vector<8x96xf32>
    %11 = arith.addf %8, %10 : vector<8x96xf32>
    %c0_10 = arith.constant 0 : index
    %c0_11 = arith.constant 0 : index
    %12 = vector.load %arg1[%c0_10, %c0_11] : memref<8x12xf32, #tpu.memory_space<vmem>>, vector<8x12xf32>
    %c0_12 = arith.constant 0 : index
    %c0_13 = arith.constant 0 : index
    %13 = vector.load %arg6[%c0_12, %c0_13] : memref<12x96xf32, #tpu.memory_space<vmem>>, vector<12x96xf32>
    %cst_14 = arith.constant dense<0.000000e+00> : vector<8x96xf32>
    %14 = tpu.matmul %12, %13, %cst_14 {dimension_numbers = #tpu.dot_dimension_numbers<[1], [0], [0], [1], [0, 0, 1, 1], [], []>} : vector<8x12xf32>, vector<12x96xf32>, vector<8x96xf32> -> vector<8x96xf32>
    %15 = arith.mulf %11, %14 : vector<8x96xf32>
    %c0_15 = arith.constant 0 : index
    %c0_16 = arith.constant 0 : index
    %16 = vector.load %arg7[%c0_15, %c0_16] : memref<96x8xf32, #tpu.memory_space<vmem>>, vector<96x8xf32>
    %cst_17 = arith.constant dense<0.000000e+00> : vector<8x8xf32>
    %17 = tpu.matmul %15, %16, %cst_17 {dimension_numbers = #tpu.dot_dimension_numbers<[1], [0], [0], [1], [0, 0, 1, 1], [], []>} : vector<8x96xf32>, vector<96x8xf32>, vector<8x8xf32> -> vector<8x8xf32>
    %c0_18 = arith.constant 0 : index
    %c0_19 = arith.constant 0 : index
    %18 = vector.load %arg8[%c0_18, %c0_19] : memref<8x8xf32, #tpu.memory_space<vmem>>, vector<8x8xf32>
    tpu.vector_store %arg8[%c0_18, %c0_19], %17 {strides = array<i32>} : memref<8x8xf32, #tpu.memory_space<vmem>>, vector<8x8xf32>,
    return
  }
}

</mosaic_0001>

<bundles_post_ra>
// kernel: hyper_linear_ssm_forward.1
= control target key start
LH: loop header
LB: loop body
LE: loop exit
PB: predicated region body
PF: predicated region fallthrough
CT: control target
= control target key end

     0   :  { %vm44_vm0 = vcmask 1043456   ;;  %v513_v1 = vmov 0.0   ;;  %vm514_vm1 = vmmov 0   ;;  %s684_s0 = inlined_call_operand.vmem [shape: f32[8,12], index: 0, kind: input, shape index: {}, may-alias: {0,1}]   ;;  %s685_s1 = inlined_call_operand.vmem [shape: f32[8,12], index: 1, kind: input, shape index: {}, may-alias: {0,1}]   ;;  %s686_s2 = inlined_call_operand.vmem [shape: f32[12,64], index: 2, kind: input, shape index: {}]   ;;  %s687_s3 = inlined_call_operand.vmem [shape: f32[1,64], index: 3, kind: input, shape index: {}]   ;;  %s688_s4 = inlined_call_operand.vmem [shape: f32[64,96], index: 4, kind: input, shape index: {}]   ;;  %s689_s5 = inlined_call_operand.vmem [shape: f32[1,96], index: 5, kind: input, shape index: {}]   ;;  %s690_s6 = inlined_call_operand.vmem [shape: f32[12,96], index: 6, kind: input, shape index: {}]   ;;  %s691_s7 = inlined_call_operand.vmem [shape: f32[96,8], index: 7, kind: input, shape index: {}]   ;;  %s692_s8 = inlined_call_operand.hbm [shape: f32[8,8], index: 8, kind: output, shape index: {}]  }
   0x1   :  { %v32_v0 = vld [vmem:[%s686_s2 + $0x8] sm:$0xf]  ;;  %426 = vmatprep.subr.mxu1 %v513_v1  ;;  %v31_v2 = vld [vmem:[%s686_s2] sm:$0xff]  ;;  %430 = vmatprep.mubr.msk.f32.mxu1 %vm514_vm1, %v513_v1 }
   0x2   :  { %13 = vsyncpa [#allocation3], 0  ;;  %427 = vmatpush3.msk.msra.mxu1 %vm44_vm0, %v32_v0  ;;  %v30_v3 = vld [vmem:[%s684_s0] sm:$0xff]  ;;  %vm40_vm2 = vcmask 97280   ;;  %459 = vmatprep.subr.mxu0 %v513_v1  ;;  %v126_v4 = vld [vmem:[%s688_s4 + $0x38] sm:$0xff]  ;;  %vm134_vm3 = vcmask 523264  }
   0x3   :  { %428 = vmatprep.subr.mxu1 %v513_v1  ;;  %483 = vmatprep.mubr.msk.f32.mxu0 %vm514_vm1, %v513_v1  ;;  %v125_v5 = vld [vmem:[%s688_s4 + $0x30] sm:$0xff]  ;;  %v124_v6 = vld [vmem:[%s688_s4 + $0x28] sm:$0xff]  ;;  %v123_v7 = vld [vmem:[%s688_s4 + $0x20] sm:$0xff]  ;;  %vm300_vm4 = vcmask 785408   ;;  %vm374_vm5 = vcmask 64512  }
   0x4   :  { %429 = vmatpush3.msra.mxu1 %v31_v2  ;;  %v122_v8 = vld [vmem:[%s688_s4 + $0x18] sm:$0xff]  ;;  %v121_v9 = vld [vmem:[%s688_s4 + $0x10] sm:$0xff]  ;;  %v120_v10 = vld [vmem:[%s688_s4 + $0x8] sm:$0xff] }
   0x5   :  { %431 = vmatmul.mubr.msk.f32.vlgmr.msra.gmra.mxu1 %vm40_vm2, %v30_v3  ;;  %433 = vmatprep.subr.mxu1 %v513_v1  ;;  %v119_v11 = vld [vmem:[%s688_s4] sm:$0xff]  ;;  %v299_v12 = vld [vmem:[%s691_s7 + $0x58] sm:$0xff]  ;;  %v298_v13 = vld [vmem:[%s691_s7 + $0x50] sm:$0xff]  ;;  %s515_s4 = smov [#allocation2]  }
   0x6   :  { %449 = vmatprep.mubr.msk.f32.mxu1 %vm514_vm1, %v513_v1  ;;  %434 = vmatpush3.msra.mxu1 %v126_v4  ;;  %v297_v14 = vld [vmem:[%s691_s7 + $0x48] sm:$0xff]  ;;  %v296_v15 = vld [vmem:[%s691_s7 + $0x40] sm:$0xff]  ;;  %v295_v16 = vld [vmem:[%s691_s7 + $0x38] sm:$0xff]  ;;  %s382_s9 = sshll.u32 %s515_s4, 4  ;;  %s383_s9 = int_to_ptr.vmem [resolvable:$true] %s382_s9 }
   0x7   :  { %435 = vmatprep.subr.mxu1 %v513_v1  ;;  %460 = vmatpush3.msra.mxu0 %v299_v12  ;;  %v294_v17 = vld [vmem:[%s691_s7 + $0x30] sm:$0xff]  ;;  %v293_v18 = vld [vmem:[%s691_s7 + $0x28] sm:$0xff]  ;;  %v292_v19 = vld [vmem:[%s691_s7 + $0x20] sm:$0xff]  ;;  %p496_p1 = scmp.lt.s32.totalorder %s383_s9, %s383_s9 }
   0x8   :  { %436 = vmatpush3.msra.mxu1 %v125_v5  ;;  %461 = vmatprep.subr.mxu0 %v513_v1  ;;  %v390_v20 = vld [vmem:[%s687_s3] ss:$0 sm:$0xff]  ;;  %v210_v24 = vld [vmem:[%s690_s6 + $0x8] sm:$0xf]  ;;  %v291_v28 = vld [vmem:[%s691_s7 + $0x18] sm:$0xff] }
   0x9   :  { %437 = vmatprep.subr.mxu1 %v513_v1  ;;  %462 = vmatpush3.msra.mxu0 %v298_v13  ;;  %v209_v26 = vld [vmem:[%s690_s6] sm:$0xff]  ;;  %v290_v29 = vld [vmem:[%s691_s7 + $0x10] sm:$0xff]  ;;  %v289_v30 = vld [vmem:[%s691_s7 + $0x8] sm:$0xff] }
   0xa   :  { %438 = vmatpush3.msra.mxu1 %v124_v6  ;;  %463 = vmatprep.subr.mxu0 %v513_v1  ;;  %v208_v27 = vld [vmem:[%s685_s1] sm:$0xff] }
   0xb   :  { %439 = vmatprep.subr.mxu1 %v513_v1  ;;  %464 = vmatpush3.msra.mxu0 %v297_v14  ;;  %v288_v31 = vld [vmem:[%s691_s7] sm:$0xff]  ;;  %s491_s7 = scalar_lea.vmem %s383_s9, 128 }
   0xc   :  { %440 = vmatpush3.msra.mxu1 %v123_v7  ;;  %465 = vmatprep.subr.mxu0 %v513_v1  ;;  %v393_v32 = vld [vmem:[%s689_s5] ss:$0 sm:$0xff]  ;;  %p492_p0 = scmp.ne.s32.totalorder %s383_s9, %s491_s7  ;;  %p497_p2 = scmp.lt.s32.totalorder %s491_s7, %s491_s7 }
   0xd   :  { %441 = vmatprep.subr.mxu1 %v513_v1  ;;  %466 = vmatpush3.msra.mxu0 %v296_v15 }
   0xe   :  { %442 = vmatpush3.msra.mxu1 %v122_v8  ;;  %467 = vmatprep.subr.mxu0 %v513_v1  ;;  %p498_p3 = por %p497_p2, %p496_p1 }
   0xf   :  { %443 = vmatprep.subr.mxu1 %v513_v1  ;;  %468 = vmatpush3.msra.mxu0 %v295_v16 }
  0x10   :  { %444 = vmatpush3.msra.mxu1 %v121_v9  ;;  %469 = vmatprep.subr.mxu0 %v513_v1  ;;  %p499_p4 = pnand %p498_p3, %p492_p0 }
  0x11   :  { %445 = vmatprep.subr.mxu1 %v513_v1  ;;  %470 = vmatpush3.msra.mxu0 %v294_v17 }
  0x12   :  { %446 = vmatpush3.msra.mxu1 %v120_v10  ;;  %471 = vmatprep.subr.mxu0 %v513_v1 }
  0x13   :  { %447 = vmatprep.subr.mxu1 %v513_v1  ;;  %472 = vmatpush3.msra.mxu0 %v293_v18 }
  0x14   :  { %448 = vmatpush3.msra.mxu1 %v119_v11  ;;  %473 = vmatprep.subr.mxu0 %v513_v1 }
  0x15   :  { %452 = vmatprep.subr.mxu1 %v513_v1  ;;  %474 = vmatpush3.msra.mxu0 %v292_v19 }
  0x16   :  { %475 = vmatprep.subr.mxu0 %v513_v1 }
  0x17   :  { %476 = vmatpush3.msra.mxu0 %v291_v28 }
  0x18   :  { %477 = vmatprep.subr.mxu0 %v513_v1 }
  0x19   :  { %478 = vmatpush3.msra.mxu0 %v290_v29 }
  0x1a   :  { %479 = vmatprep.subr.mxu0 %v513_v1 }
  0x1b   :  { %480 = vmatpush3.msra.mxu0 %v289_v30 }
  0x1c   :  { %481 = vmatprep.subr.mxu0 %v513_v1 }
  0x1d   :  { %482 = vmatpush3.msra.mxu0 %v288_v31 }
  0xc5   :  { %v114_v21 = vpop.f32.mrf.mxu1 }
  0xc6   :  { %v115_v22 = vadd.f32 %v390_v20, %v114_v21 }
  0xc7   :  { %v432_v23 = vpop.f32.mrf.mxu1 }
  0xc8   :  { %489 = vtanh.f32 %v115_v22 }
  0xd5   :  { %v490_v25 = vpop.eup %489 }
  0xd6   :  { %450 = vmatmul.mubr.msk.f32.vlgmr.msra.gmra.mxu1 %vm134_vm3, %v490_v25 }
  0xd7   :  { %453 = vmatpush3.msk.msra.mxu1 %vm44_vm0, %v210_v24  ;;  %456 = vmatprep.mubr.msk.f32.mxu1 %vm514_vm1, %v513_v1 }
  0xd8   :  { %454 = vmatprep.subr.mxu1 %v513_v1 }
  0xd9   :  { %455 = vmatpush3.msra.mxu1 %v209_v26 }
  0xda   :  { %457 = vmatmul.mubr.msk.f32.vlgmr.msra.gmra.mxu1 %vm40_vm2, %v208_v27 }
 0x196   :  { %v204_v33 = vpop.f32.mrf.mxu1 }
 0x197   :  { %v205_v35 = vadd.f32 %v393_v32, %v204_v33 }
 0x198   :  { %v451_v34 = vpop.f32.mrf.mxu1 }
 0x19a   :  { %v283_v36 = vpop.f32.mrf.mxu1 }
 0x19b   :  { %v287_v37 = vmul.f32 %v283_v36, %v205_v35 }
 0x19c   :  { %v458_v38 = vpop.f32.mrf.mxu1 }
 0x19d   :  { %484 = vmatmul.mubr.msk.f32.vlgmr.msra.gmra.mxu0 %vm300_vm4, %v287_v37 }
 0x25d   :  { %v370_v39 = vpop.f32.mrf.mxu0 }
 0x25e   :  { %375 = vst.msk [vmem:[#allocation2] sm:$0xff] %vm374_vm5, %v370_v39 }
 0x25f   :  { %v485_v40 = vpop.f32.mrf.mxu0 }
 0x260   :  { %502 = shalt.err (!%p499_p4)
}
 0x261   :  { %385 = dma.vmem_to_hbm [thread:$0]  %s383_s9, 128, %s692_s8, [#allocation3]  }
 0x262   :  { %511 = dma.done.wait [#allocation3], 128  }
 0x263   :  { %512 = vsyncadd [#allocation3], 4294967168 }
 0x264   :  { %389 = vsyncpa [#allocation3], 1 }

</bundles_post_ra>
